<compile_context>
chip_gen: v7x
topology: tpu7x:2x2x1
jax: 0.10.0
libtpu: 0.0.40
codegen_flags: <defaults>
</compile_context>

<pallas_src>
import functools

import jax
import jax.numpy as jnp
from jax.experimental import pallas as pl
from jax.experimental.pallas import tpu as pltpu


def _round_up(n, m):
    return ((n + m - 1) // m) * m


def _cdiv(a, b):
    return -(-a // b)


def a3c_fused_kernel(x_ref, w1_ref, b1_ref, w2_ref, b2_ref, out_ref, *,
                     compute_dtype):
    """One batch tile of the fused A3C forward.

    h = tanh(x @ W1_cat + b1_cat)        # (Tb, 2H), f32 elementwise
    y = h @ W2_blockdiag + b2_cat        # (Tb, a_dim + 1), f32
    Policy logits are columns [0, a_dim), the value is column a_dim.
    """
    x = x_ref[...].astype(compute_dtype)               # in-kernel cast (f32 -> bf16)
    h = jnp.tanh(
        jnp.dot(x, w1_ref[...], preferred_element_type=jnp.float32)
        + b1_ref[...]                                   # f32 bias, f32 tanh
    )
    y = (
        jnp.dot(h.astype(w2_ref.dtype), w2_ref[...],
                preferred_element_type=jnp.float32)
        + b2_ref[...]
    )
    out_ref[...] = y


def prepare_params(params, compute_dtype=jnp.bfloat16):
    """One-time packing of the two heads into a single fused network.

    Layer 1: W1_cat = [w1p | w1v]  -> (s_dim, 2H)
    Layer 2: block-diagonal W2     -> (2H, a_dim + 1)
    Weights are stored (in_features, out_features) = torch weight.T, biases (1, out).
    """
    hidden = params["w1p"].shape[1]
    a_dim = params["w2p"].shape[1]
    out_dim = a_dim + 1

    w1 = jnp.concatenate([params["w1p"], params["w1v"]], axis=1)     # (s_dim, 2H)
    b1 = jnp.concatenate([params["b1p"], params["b1v"]], axis=1)     # (1, 2H)

    w2 = jnp.zeros((2 * hidden, out_dim), jnp.float32)
    w2 = w2.at[:hidden, :a_dim].set(params["w2p"])
    w2 = w2.at[hidden:, a_dim:].set(params["w2v"])
    b2 = jnp.zeros((1, out_dim), jnp.float32)
    b2 = b2.at[:, :a_dim].set(params["b2p"])
    b2 = b2.at[:, a_dim:].set(params["b2v"])

    return {
        "w1": w1.astype(compute_dtype),   # MXU operand
        "b1": b1.astype(jnp.float32),     # f32 bias (f32 elementwise in-kernel)
        "w2": w2.astype(compute_dtype),   # MXU operand
        "b2": b2.astype(jnp.float32),
    }


def a3c_net_forward(x, packed, *, max_tile=8192):
    """x: (B, s_dim) f32, packed: output of prepare_params.

    Returns (actions (B, a_dim) f32, values (B, 1) f32) matching torch Net.forward.
    """
    B, s_dim = x.shape
    two_h = packed["w1"].shape[1]
    out_dim = packed["w2"].shape[1]
    a_dim = out_dim - 1
    compute_dtype = packed["w1"].dtype

    # ---- Batch tiling ------------------------------------------------------
    # Big tiles amortize the ~0.35us/step grid overhead; tile is derived from B
    # (ragged-aware), and large batches get an even number of >=2 grid steps so
    # the "parallel" batch axis can shard across v7x's two TensorCores.
    n_steps = max(1, _cdiv(B, max_tile))
    if B >= 2048:
        n_steps = max(n_steps, 2)
        n_steps += n_steps % 2
    tile = _round_up(_cdiv(B, n_steps), 8)              # sublane-aligned
    b_pad = n_steps * tile
    x_in = x if b_pad == B else jnp.pad(x, ((0, b_pad - B), (0, 0)))

    kernel = functools.partial(a3c_fused_kernel, compute_dtype=compute_dtype)

    out = pl.pallas_call(
        kernel,
        out_shape=jax.ShapeDtypeStruct((b_pad, out_dim), jnp.float32),
        grid_spec=pltpu.PrefetchScalarGridSpec(
            num_scalar_prefetch=0,
            grid=(n_steps,),
            in_specs=[
                pl.BlockSpec((tile, s_dim), lambda i: (i, 0)),       # x tile
                pl.BlockSpec((s_dim, two_h), lambda i: (0, 0)),      # W1 (resident)
                pl.BlockSpec((1, two_h), lambda i: (0, 0)),          # b1
                pl.BlockSpec((two_h, out_dim), lambda i: (0, 0)),    # W2 (resident)
                pl.BlockSpec((1, out_dim), lambda i: (0, 0)),        # b2
            ],
            out_specs=pl.BlockSpec((tile, out_dim), lambda i: (i, 0)),
        ),
        compiler_params=pltpu.CompilerParams(
            dimension_semantics=("parallel",),    # megacore-shard batch (v7x)
            vmem_limit_bytes=48 * 1024 * 1024,    # big tiles need > default scoped VMEM
        ),
    )(x_in, packed["w1"], packed["b1"], packed["w2"], packed["b2"])

    out = out[:B]
    actions = out[:, :a_dim]
    values = out[:, a_dim:out_dim]
    return actions, values


def init_params(key, s_dim, a_dim, hidden=128):
    """Matches set_init: weights ~ N(0, 0.1), biases = 0. Stored (in, out)."""
    k1, k2, k3, k4 = jax.random.split(key, 4)
    std = 0.1
    return {
        "w1p": std * jax.random.normal(k1, (s_dim, hidden), jnp.float32),
        "b1p": jnp.zeros((1, hidden), jnp.float32),
        "w2p": std * jax.random.normal(k2, (hidden, a_dim), jnp.float32),
        "b2p": jnp.zeros((1, a_dim), jnp.float32),
        "w1v": std * jax.random.normal(k3, (s_dim, hidden), jnp.float32),
        "b1v": jnp.zeros((1, hidden), jnp.float32),
        "w2v": std * jax.random.normal(k4, (hidden, 1), jnp.float32),
        "b2v": jnp.zeros((1, 1), jnp.float32),
    }


def reference_forward(x, p):
    hp = jnp.tanh(x @ p["w1p"] + p["b1p"])
    actions = hp @ p["w2p"] + p["b2p"]
    hv = jnp.tanh(x @ p["w1v"] + p["b1v"])
    values = hv @ p["w2v"] + p["b2v"]
    return actions, values


if __name__ == "__main__":
    key = jax.random.PRNGKey(0)
    kx, kp, kx2 = jax.random.split(key, 3)

    B, s_dim, a_dim = 2, 8, 4
    x = jax.random.normal(kx, (B, s_dim), jnp.float32)
    params = init_params(kp, s_dim, a_dim)
    ref_a, ref_v = reference_forward(x, params)

    # Exact-precision path (f32 MXU operands): tight check vs. reference.
    packed_f32 = prepare_params(params, compute_dtype=jnp.float32)
    a32, v32 = a3c_net_forward(x, packed_f32)
    jax.block_until_ready((a32, v32))
    assert a32.shape == (B, a_dim) and v32.shape == (B, 1)
    assert jnp.allclose(a32, ref_a, atol=1e-4, rtol=1e-4)
    assert jnp.allclose(v32, ref_v, atol=1e-4, rtol=1e-4)

    # Default fast path (bf16 MXU operands, f32 accumulate/elementwise).
    packed_bf16 = prepare_params(params, compute_dtype=jnp.bfloat16)
    actions, values = a3c_net_forward(x, packed_bf16)
    jax.block_until_ready((actions, values))
    assert actions.shape == (B, a_dim) and values.shape == (B, 1)
    assert jnp.allclose(actions, ref_a, atol=5e-2, rtol=5e-2)
    assert jnp.allclose(values, ref_v, atol=5e-2, rtol=5e-2)

    # Multi-step grid + ragged batch exercise (still tiny: 3000 x 8 f32).
    B2 = 3000
    x2 = jax.random.normal(kx2, (B2, s_dim), jnp.float32)
    ref_a2, ref_v2 = reference_forward(x2, params)
    a2, v2 = a3c_net_forward(x2, packed_f32)
    jax.block_until_ready((a2, v2))
    assert a2.shape == (B2, a_dim) and v2.shape == (B2, 1)
    assert jnp.allclose(a2, ref_a2, atol=1e-4, rtol=1e-4)
    assert jnp.allclose(v2, ref_v2, atol=1e-4, rtol=1e-4)

    print("KERNEL_OK")
</pallas_src>

<mosaic_0001>
module attributes {stable_mosaic.version = 11 : i64} {
  func.func @a3c_fused_kernel(%arg0: i32, %arg1: memref<8x8xf32, #tpu.memory_space<vmem>>, %arg2: memref<8x256xf32, #tpu.memory_space<vmem>>, %arg3: memref<1x256xf32, #tpu.memory_space<vmem>>, %arg4: memref<256x5xf32, #tpu.memory_space<vmem>>, %arg5: memref<1x5xf32, #tpu.memory_space<vmem>>, %arg6: memref<8x5xf32, #tpu.memory_space<vmem>>) attributes {dimension_semantics = [#tpu.dimension_semantics<parallel>], iteration_bounds = array<i64: 1>, scalar_prefetch = 0 : i64, scratch_operands = 0 : i64, tpu.core_type = #tpu.core_type<tc>, window_params = [{transform_indices = @transform_0, window_bounds = array<i64: 8, 8>}, {pipeline_mode = #tpu.pipeline_mode<synchronous>, transform_indices = @transform_1, window_bounds = array<i64: 8, 256>}, {pipeline_mode = #tpu.pipeline_mode<synchronous>, transform_indices = @transform_2, window_bounds = array<i64: 1, 256>}, {pipeline_mode = #tpu.pipeline_mode<synchronous>, transform_indices = @transform_3, window_bounds = array<i64: 256, 5>}, {pipeline_mode = #tpu.pipeline_mode<synchronous>, transform_indices = @transform_4, window_bounds = array<i64: 1, 5>}, {transform_indices = @transform_5, window_bounds = array<i64: 8, 5>}]} {
    %c0 = arith.constant 0 : index
    %c0_0 = arith.constant 0 : index
    %0 = vector.load %arg1[%c0, %c0_0] : memref<8x8xf32, #tpu.memory_space<vmem>>, vector<8x8xf32>
    %c0_1 = arith.constant 0 : index
    %c0_2 = arith.constant 0 : index
    %1 = vector.load %arg2[%c0_1, %c0_2] : memref<8x256xf32, #tpu.memory_space<vmem>>, vector<8x256xf32>
    %cst = arith.constant dense<0.000000e+00> : vector<8x256xf32>
    %2 = tpu.matmul %0, %1, %cst {dimension_numbers = #tpu.dot_dimension_numbers<[1], [0], [0], [1], [0, 0, 1, 1], [], []>} : vector<8x8xf32>, vector<8x256xf32>, vector<8x256xf32> -> vector<8x256xf32>
    %c0_3 = arith.constant 0 : index
    %c0_4 = arith.constant 0 : index
    %3 = vector.load %arg3[%c0_3, %c0_4] : memref<1x256xf32, #tpu.memory_space<vmem>>, vector<1x256xf32>
    %4 = vector.broadcast %3 : vector<1x256xf32> to vector<8x256xf32>
    %5 = arith.addf %2, %4 : vector<8x256xf32>
    %6 = math.tanh %5 : vector<8x256xf32>
    %c0_5 = arith.constant 0 : index
    %c0_6 = arith.constant 0 : index
    %7 = vector.load %arg4[%c0_5, %c0_6] : memref<256x5xf32, #tpu.memory_space<vmem>>, vector<256x5xf32>
    %cst_7 = arith.constant dense<0.000000e+00> : vector<8x5xf32>
    %8 = tpu.matmul %6, %7, %cst_7 {dimension_numbers = #tpu.dot_dimension_numbers<[1], [0], [0], [1], [0, 0, 1, 1], [], []>} : vector<8x256xf32>, vector<256x5xf32>, vector<8x5xf32> -> vector<8x5xf32>
    %c0_8 = arith.constant 0 : index
    %c0_9 = arith.constant 0 : index
    %9 = vector.load %arg5[%c0_8, %c0_9] : memref<1x5xf32, #tpu.memory_space<vmem>>, vector<1x5xf32>
    %10 = vector.broadcast %9 : vector<1x5xf32> to vector<8x5xf32>
    %11 = arith.addf %8, %10 : vector<8x5xf32>
    %c0_10 = arith.constant 0 : index
    %c0_11 = arith.constant 0 : index
    %12 = vector.load %arg6[%c0_10, %c0_11] : memref<8x5xf32, #tpu.memory_space<vmem>>, vector<8x5xf32>
    tpu.vector_store %arg6[%c0_10, %c0_11], %11 {strides = array<i32>} : memref<8x5xf32, #tpu.memory_space<vmem>>, vector<8x5xf32>,
    return
  }
  func.func @transform_0(%arg0: i32) -> (i32, i32) {
    %c0_i32 = arith.constant 0 : i32
    %c0_i32_0 = arith.constant 0 : i32
    return %arg0, %c0_i32 : i32, i32
  }
  func.func @transform_1(%arg0: i32) -> (i32, i32) {
    %c0_i32 = arith.constant 0 : i32
    %c0_i32_0 = arith.constant 0 : i32
    %c0_i32_1 = arith.constant 0 : i32
    return %c0_i32, %c0_i32_0 : i32, i32
  }
  func.func @transform_2(%arg0: i32) -> (i32, i32) {
    %c0_i32 = arith.constant 0 : i32
    %c0_i32_0 = arith.constant 0 : i32
    %c0_i32_1 = arith.constant 0 : i32
    return %c0_i32, %c0_i32_0 : i32, i32
  }
  func.func @transform_3(%arg0: i32) -> (i32, i32) {
    %c0_i32 = arith.constant 0 : i32
    %c0_i32_0 = arith.constant 0 : i32
    %c0_i32_1 = arith.constant 0 : i32
    return %c0_i32, %c0_i32_0 : i32, i32
  }
  func.func @transform_4(%arg0: i32) -> (i32, i32) {
    %c0_i32 = arith.constant 0 : i32
    %c0_i32_0 = arith.constant 0 : i32
    %c0_i32_1 = arith.constant 0 : i32
    return %c0_i32, %c0_i32_0 : i32, i32
  }
  func.func @transform_5(%arg0: i32) -> (i32, i32) {
    %c0_i32 = arith.constant 0 : i32
    %c0_i32_0 = arith.constant 0 : i32
    return %arg0, %c0_i32 : i32, i32
  }
}

</mosaic_0001>

<bundles_post_ra>
// kernel: tpu_custom_call.1
= control target key start
LH: loop header
LB: loop body
LE: loop exit
PB: predicated region body
PF: predicated region fallthrough
CT: control target
= control target key end

     0   :  { %vm36_vm0 = vcmask 64512   ;;  %v337_v3 = vmov 0.0   ;;  %s492_s0 = inlined_call_operand.vmem [shape: f32[8,8], index: 0, kind: input, shape index: {}]   ;;  %s493_s1 = inlined_call_operand.vmem [shape: f32[8,256], index: 1, kind: input, shape index: {}]   ;;  %s494_s2 = inlined_call_operand.vmem [shape: f32[1,256], index: 2, kind: input, shape index: {}]   ;;  %s495_s3 = inlined_call_operand.vmem [shape: f32[256,5], index: 3, kind: input, shape index: {}]   ;;  %s496_s4 = inlined_call_operand.vmem [shape: f32[1,5], index: 4, kind: input, shape index: {}]   ;;  %s497_s5 = inlined_call_operand.hbm [shape: f32[8,5], index: 5, kind: output, shape index: {}]  }
   0x1   :  { %v23_v0 = vld [vmem:[%s493_s1 + $0x8] sm:$0xff]  ;;  %v22_v1 = vld [vmem:[%s493_s1] sm:$0xff]  ;;  %104 = vmatprep.mubr.f32.mxu0 %v337_v3  ;;  %v131_v9 = vld [vmem:[%s495_s3 + $0x90] sm:$0xff] }
   0x2   :  { %v21_v2 = vld [vmem:[%s492_s0] sm:$0xff]  ;;  %40 = vmatprep.subr.mxu0 %v23_v0  ;;  %v130_v5 = vld [vmem:[%s495_s3 + $0x88] sm:$0xff]  ;;  %v132_v10 = vld [vmem:[%s495_s3 + $0x98] sm:$0xff] }
   0x3   :  { %v129_v4 = vld [vmem:[%s495_s3 + $0x80] sm:$0xff]  ;;  %41 = vmatpush1.msra.mxu0 %v22_v1  ;;  %v114_v8 = vld [vmem:[%s495_s3 + $0x8] sm:$0xff]  ;;  %v279_v12 = vpack.c.bf16 %v132_v10, %v131_v9  ;;  %v115_v13 = vld [vmem:[%s495_s3 + $0x10] sm:$0xff] }
   0x4   :  { %v113_v6 = vld [vmem:[%s495_s3] sm:$0xff]  ;;  %v275_v7 = vpack.c.bf16 %v130_v5, %v129_v4  ;;  %238 = vmatmul.mubr.msk.f32.vlgmr.msra.gmra.mrb[0].mxu0 %vm36_vm0, %v21_v2  ;;  %v116_v14 = vld [vmem:[%s495_s3 + $0x18] sm:$0xff]  ;;  %v134_v16 = vld [vmem:[%s495_s3 + $0xa8] sm:$0xff] }
   0x5   :  { %v277_v11 = vpack.c.bf16 %v114_v8, %v113_v6  ;;  %v133_v15 = vld [vmem:[%s495_s3 + $0xa0] sm:$0xff]  ;;  %v281_v17 = vpack.c.bf16 %v116_v14, %v115_v13  ;;  %v118_v20 = vld [vmem:[%s495_s3 + $0x28] sm:$0xff] }
   0x6   :  { %276 = vmatprep.subr.bf16.mxu1 %v275_v7  ;;  %v283_v18 = vpack.c.bf16 %v134_v16, %v133_v15  ;;  %v117_v19 = vld [vmem:[%s495_s3 + $0x20] sm:$0xff] }
   0x7   :  { %278 = vmatpush3.bf16.msra.mxu1 %v277_v11 }
   0x8   :  { %280 = vmatprep.subr.bf16.mxu1 %v279_v12 }
   0x9   :  { %10 = vsyncpa [#allocation3], 0  ;;  %v135_v21 = vld [vmem:[%s495_s3 + $0xb0] sm:$0xff]  ;;  %v136_v22 = vld [vmem:[%s495_s3 + $0xb8] sm:$0xff]  ;;  %v285_v23 = vpack.c.bf16 %v118_v20, %v117_v19  ;;  %v26_v52 = vlaneseq  ;;  %vm222_vm1 = vcmask 39936  }
   0xa   :  { %v287_v24 = vpack.c.bf16 %v136_v22, %v135_v21  ;;  %v119_v25 = vld [vmem:[%s495_s3 + $0x30] sm:$0xff]  ;;  %v120_v26 = vld [vmem:[%s495_s3 + $0x38] sm:$0xff]  ;;  %v137_v28 = vld [vmem:[%s495_s3 + $0xc0] sm:$0xff] }
   0xb   :  { %282 = vmatpush3.bf16.msra.mxu1 %v281_v17  ;;  %v289_v27 = vpack.c.bf16 %v120_v26, %v119_v25  ;;  %v138_v29 = vld [vmem:[%s495_s3 + $0xc8] sm:$0xff]  ;;  %v121_v31 = vld [vmem:[%s495_s3 + $0x40] sm:$0xff]  ;;  %v139_v34 = vld [vmem:[%s495_s3 + $0xd0] sm:$0xff]  ;;  %v27_v53 = vshrl.u32 %v26_v52, 7 }
   0xc   :  { %284 = vmatprep.subr.bf16.mxu1 %v283_v18  ;;  %v291_v30 = vpack.c.bf16 %v138_v29, %v137_v28  ;;  %v122_v32 = vld [vmem:[%s495_s3 + $0x48] sm:$0xff]  ;;  %v140_v35 = vld [vmem:[%s495_s3 + $0xd8] sm:$0xff]  ;;  %v123_v37 = vld [vmem:[%s495_s3 + $0x50] sm:$0xff] }
   0xd   :  { %v293_v33 = vpack.c.bf16 %v122_v32, %v121_v31  ;;  %v295_v36 = vpack.c.bf16 %v140_v35, %v139_v34  ;;  %v124_v38 = vld [vmem:[%s495_s3 + $0x58] sm:$0xff]  ;;  %v141_v40 = vld [vmem:[%s495_s3 + $0xe0] sm:$0xff]  ;;  %v142_v41 = vld [vmem:[%s495_s3 + $0xe8] sm:$0xff]  ;;  %v28_v54 = vsub.s32 0, %v27_v53  ;;  %v32_v56 = vsub.s32 1, %v27_v53 }
   0xe   :  { %v297_v39 = vpack.c.bf16 %v124_v38, %v123_v37  ;;  %v125_v42 = vld [vmem:[%s495_s3 + $0x60] sm:$0xff]  ;;  %v299_v43 = vpack.c.bf16 %v142_v41, %v141_v40  ;;  %v126_v44 = vld [vmem:[%s495_s3 + $0x68] sm:$0xff]  ;;  %v143_v45 = vld [vmem:[%s495_s3 + $0xf0] sm:$0xff] }
   0xf   :  { %286 = vmatpush3.bf16.msra.mxu1 %v285_v23  ;;  %v144_v46 = vld [vmem:[%s495_s3 + $0xf8] sm:$0xff]  ;;  %v301_v47 = vpack.c.bf16 %v126_v44, %v125_v42  ;;  %v127_v49 = vld [vmem:[%s495_s3 + $0x70] sm:$0xff]  ;;  %v24_v55 = vld [vmem:[%s494_s2] sm:$0x3]  ;;  %s338_s2 = smov [#allocation2]  }
  0x10   :  { %288 = vmatprep.subr.bf16.mxu1 %v287_v24  ;;  %v303_v48 = vpack.c.bf16 %v144_v46, %v143_v45  ;;  %v128_v50 = vld [vmem:[%s495_s3 + $0x78] sm:$0xff]  ;;  %v29_v57 = vrot.slane %v24_v55, %v28_v54  ;;  %v33_v58 = vrot.slane %v24_v55, %v32_v56  ;;  %v239_v2 = vld [vmem:[%s496_s4] ss:$0 sm:$0xff]  ;;  %s230_s10 = sshll.u32 %s338_s2, 4  ;;  %s231_s10 = int_to_ptr.vmem [resolvable:$true] %s230_s10 }
  0x11   :  { %v305_v51 = vpack.c.bf16 %v128_v50, %v127_v49  ;;  %s313_s11 = scalar_lea.vmem %s231_s10, 128  ;;  %p318_p1 = scmp.lt.s32.totalorder %s231_s10, %s231_s10 }
  0x12   :  { %p314_p0 = scmp.ne.s32.totalorder %s231_s10, %s313_s11  ;;  %p319_p2 = scmp.lt.s32.totalorder %s313_s11, %s313_s11 }
  0x13   :  { %290 = vmatpush3.bf16.msra.mxu1 %v289_v27 }
  0x14   :  { %292 = vmatprep.subr.bf16.mxu1 %v291_v30  ;;  %p320_p3 = por %p319_p2, %p318_p1 }
  0x16   :  { %p321_p4 = pnand %p320_p3, %p314_p0 }
  0x17   :  { %294 = vmatpush3.bf16.msra.mxu1 %v293_v33 }
  0x18   :  { %296 = vmatprep.subr.bf16.mxu1 %v295_v36 }
  0x1b   :  { %298 = vmatpush3.bf16.msra.mxu1 %v297_v39 }
  0x1c   :  { %300 = vmatprep.subr.bf16.mxu1 %v299_v43 }
  0x1f   :  { %302 = vmatpush3.bf16.msra.mxu1 %v301_v47 }
  0x20   :  { %304 = vmatprep.subr.bf16.mxu1 %v303_v48 }
  0x23   :  { %306 = vmatpush3.bf16.msra.mxu1 %v305_v51 }
  0xd7   :  { %v106_v59 = vpop.f32.mrb[0].mxu0 }
  0xd8   :  { %v107_v60 = vadd.f32 %v106_v59, %v29_v57  ;;  %v108_v61 = vpop.f32.mrb[1].mxu0 }
  0xd9   :  { %v109_v62 = vadd.f32 %v108_v61, %v33_v58 }
  0xdb   :  { %309 = vtanh.f32 %v109_v62 }
  0xdc   :  { %311 = vtanh.f32 %v107_v60 }
  0xe5   :  { %v310_v63 = vpop.eup %309 }
  0xe6   :  { %v312_v0 = vpop.eup %311  ;;  %216 = vmatprep.mubr.f32.mxu1 %v310_v63 }
  0xe7   :  { %217 = vmatmul.mubr.f32.vlgmr.msra.gmra.mrb[0].mxu1 %v312_v0 }
 0x1ba   :  { %v272_v1 = vpop.f32.mrb[0].mxu1 }
 0x1bb   :  { %v273_v3 = vpop.f32.mrb[1].mxu1 }
 0x1bc   :  { %v274_v4 = vadd.f32 %v273_v3, %v272_v1 }
 0x1be   :  { %v219_v5 = vadd.f32 %v274_v4, %v239_v2 }
 0x1c0   :  { %223 = vst.msk [vmem:[#allocation2] sm:$0xff] %vm222_vm1, %v219_v5 }
 0x1c1   :  { %324 = shalt.err (!%p321_p4)
}
 0x1c2   :  { %s325_s14 = scalar_lea.hbm %s497_s5, 128 }
 0x1c3   :  { %p326_p5 = scmp.ne.s32.totalorder %s497_s5, %s325_s14  ;;  %p329_p6 = scmp.lt.u32.totalorder %s325_s14, %s497_s5 }
 0x1c5   :  { %p331_p7 = pnand %p329_p6, %p326_p5 }
 0x1c7   :  { %334 = shalt.err (!%p331_p7)
}
 0x1c8   :  { %233 = dma.vmem_to_hbm [thread:$0]  %s231_s10, 128, %s497_s5, [#allocation3]  }
 0x1c9   :  { %335 = dma.done.wait [#allocation3], 128  }
 0x1ca   :  { %336 = vsyncadd [#allocation3], 4294967168 }
 0x1cb   :  { %237 = vsyncpa [#allocation3], 1 }

</bundles_post_ra>
